<compile_context>
chip_gen: v5e
topology: v5e:2x2
jax: 0.10.0
libtpu: 0.0.40
codegen_flags: <defaults>
</compile_context>

<pallas_src>
import jax
import jax.numpy as jnp
from jax import lax
from jax.experimental import pallas as pl
from jax.experimental.pallas import tpu as pltpu

EPS = 1e-5


def _simclr_sender_kernel(x_ref, w1_ref, bn_ref, w2_ref, out_ref, proj_ref, acc_ref):
    """One grid step = one H tile (reduction axis of the second matmul)."""
    j = pl.program_id(0)
    n_h = pl.num_programs(0)

    @pl.when(j == 0)
    def _init():
        acc_ref[...] = jnp.zeros_like(acc_ref)

    # Linear 1 on this H tile: (B, D_in) x (tH, D_in) -> (B, tH), f32 accumulation.
    h = lax.dot_general(x_ref[...], w1_ref[...],
                        dimension_numbers=(((1,), (1,)), ((), ())),
                        preferred_element_type=jnp.float32)
    bn = bn_ref[...].astype(jnp.float32)               # (3, tH): [b1; gamma; beta]
    h = h + bn[0:1, :]                                  # + bias

    # BatchNorm1d, training-mode batch statistics (exact two-pass form).
    # B is never tiled, so per-hidden-feature stats are exact within an H tile.
    inv_b = jnp.float32(1.0 / h.shape[0])
    mean = jnp.sum(h, axis=0, keepdims=True) * inv_b                 # (1, tH)
    centered = h - mean
    var = jnp.sum(centered * centered, axis=0, keepdims=True) * inv_b
    scale = bn[1:2, :] * lax.rsqrt(var + EPS)                        # gamma * rsqrt
    proj = jnp.maximum(centered * scale + bn[2:3, :], 0.0)           # + beta, ReLU
    proj_ref[...] = proj.astype(proj_ref.dtype)

    # Linear 2 (no bias): (B, tH) x (O, tH) -> (B, O), accumulated over H tiles
    # into the resident f32 accumulator.
    acc_ref[...] += lax.dot_general(proj.astype(w2_ref.dtype), w2_ref[...],
                                    dimension_numbers=(((1,), (1,)), ((), ())),
                                    preferred_element_type=jnp.float32)

    @pl.when(j == n_h - 1)
    def _finalize():
        out_ref[...] = acc_ref[...].astype(out_ref.dtype)


def _pick_tile(n, preferred=(512, 256, 128)):
    for t in preferred:
        if n % t == 0:
            return t
    return n


def _vmem_budget_bytes():
    """Generation-aware VMEM budget with headroom (128 MiB parts vs 64 MiB v7x)."""
    cap = None
    try:
        cap = getattr(pltpu.get_tpu_info(), "vmem_capacity_bytes", None)
    except Exception:
        cap = None
    if not cap:
        cap = 64 * 1024 * 1024  # conservative fallback that also fits v7x
    return int(cap) * 3 // 4


def _step_vmem_bytes(B, d_in, O, tH, act_bytes, w1_bytes, w2_bytes,
                     proj_bytes, out_bytes):
    """Estimated per-step VMEM footprint (default double-buffered operands)."""
    return (2 * B * d_in * act_bytes        # resident x
            + 2 * tH * d_in * w1_bytes      # W1 slab
            + 2 * 8 * tH * 4                # packed BN params (sublane-padded)
            + 2 * O * tH * w2_bytes         # W2 slab
            + 2 * B * tH * proj_bytes       # proj output tile
            + 2 * B * O * out_bytes         # out output block
            + B * O * 4)                    # resident f32 accumulator


def simclr_sender_forward(x, w1, b1, gamma, beta, w2, *, tile_h=None):
    """x: (B, D_in); w1: (H, D_in); b1/gamma/beta: (H,); w2: (O, H) (native layouts).

    Returns (out, first_projection, resnet_output) like SimCLRSender.forward
    in training mode (discrete_evaluation branch not taken).
    """
    B, d_in = x.shape
    H, d_in2 = w1.shape
    O, H2 = w2.shape
    assert d_in2 == d_in and H2 == H

    out_dtype = x.dtype
    proj_dtype = jnp.float32            # BatchNorm/ReLU output kept in f32

    act_bytes = jnp.dtype(x.dtype).itemsize
    w1_bytes = jnp.dtype(w1.dtype).itemsize
    w2_bytes = jnp.dtype(w2.dtype).itemsize
    out_bytes = jnp.dtype(out_dtype).itemsize
    proj_bytes = jnp.dtype(proj_dtype).itemsize

    budget = _vmem_budget_bytes()
    tH = tile_h if tile_h is not None else _pick_tile(H)
    assert H % tH == 0
    # Shrink the H tile until the estimated per-step footprint fits the budget
    # (never clamp vmem_limit below the actual footprint); floor at 128 lanes.
    while (_step_vmem_bytes(B, d_in, O, tH, act_bytes, w1_bytes, w2_bytes,
                            proj_bytes, out_bytes) > budget
           and tH % 256 == 0):
        tH //= 2
    n_h = H // tH

    # Pack the bias and BatchNorm affine into one (3, H) f32 array -> single
    # small DMA per grid step.
    bn = jnp.stack([b1, gamma, beta], axis=0).astype(jnp.float32)

    grid_spec = pltpu.PrefetchScalarGridSpec(
        num_scalar_prefetch=0,
        grid=(n_h,),
        in_specs=[
            pl.BlockSpec((B, d_in), lambda j: (0, 0)),    # x (resident)
            pl.BlockSpec((tH, d_in), lambda j: (j, 0)),   # W1 slab
            pl.BlockSpec((3, tH), lambda j: (0, j)),      # packed b1/gamma/beta
            pl.BlockSpec((O, tH), lambda j: (0, j)),      # W2 slab
        ],
        out_specs=(
            pl.BlockSpec((B, O), lambda j: (0, 0)),       # out (resident over j)
            pl.BlockSpec((B, tH), lambda j: (0, j)),      # proj (written once)
        ),
        scratch_shapes=[pltpu.VMEM((B, O), jnp.float32)],
    )

    out, proj = pl.pallas_call(
        _simclr_sender_kernel,
        out_shape=(
            jax.ShapeDtypeStruct((B, O), out_dtype),
            jax.ShapeDtypeStruct((B, H), proj_dtype),
        ),
        grid_spec=grid_spec,
        compiler_params=pltpu.CompilerParams(
            dimension_semantics=("arbitrary",),
            vmem_limit_bytes=budget,
        ),
    )(x, w1, bn, w2)

    # .detach() is a no-op for forward values in JAX.
    return out, proj, x


def _reference_forward(x, w1, b1, gamma, beta, w2, proj_matmul_dtype=None):
    xf = x.astype(jnp.float32)
    w1f = w1.astype(jnp.float32)
    w2f = w2.astype(jnp.float32)
    h = xf @ w1f.T + b1
    mean = jnp.mean(h, axis=0, keepdims=True)
    var = jnp.mean((h - mean) ** 2, axis=0, keepdims=True)
    proj = jnp.maximum(gamma * (h - mean) / jnp.sqrt(var + EPS) + beta, 0.0)
    pm = proj
    if proj_matmul_dtype is not None:
        pm = proj.astype(proj_matmul_dtype).astype(jnp.float32)
    out = pm @ w2f.T
    return out, proj, x


def _make_inputs(key, B, d_in, H, O, dtype):
    kx, kw1, kb1, kw2 = jax.random.split(key, 4)
    x = jax.random.normal(kx, (B, d_in), jnp.float32)
    bound1 = 1.0 / (d_in ** 0.5)
    w1 = jax.random.uniform(kw1, (H, d_in), jnp.float32, minval=-bound1, maxval=bound1)
    b1 = jax.random.uniform(kb1, (H,), jnp.float32, minval=-bound1, maxval=bound1)
    gamma = jnp.ones((H,), jnp.float32)   # BatchNorm1d default weight
    beta = jnp.zeros((H,), jnp.float32)   # BatchNorm1d default bias
    bound2 = 1.0 / (H ** 0.5)
    w2 = jax.random.uniform(kw2, (O, H), jnp.float32, minval=-bound2, maxval=bound2)
    return x.astype(dtype), w1.astype(dtype), b1, gamma, beta, w2.astype(dtype)


if __name__ == "__main__":
    key = jax.random.PRNGKey(0)
    k1, k2 = jax.random.split(key)

    # --- Check 1: f32, multi-step H reduction (grid (2,), acc init/finalize).
    B, d_in, H, O = 8, 128, 256, 128
    x, w1, b1, gamma, beta, w2 = _make_inputs(k1, B, d_in, H, O, jnp.float32)
    out, proj, x_out = simclr_sender_forward(x, w1, b1, gamma, beta, w2, tile_h=128)
    jax.block_until_ready((out, proj, x_out))
    ref_out, ref_proj, _ = _reference_forward(x, w1, b1, gamma, beta, w2)
    assert jnp.allclose(out, ref_out, atol=1e-4, rtol=1e-4)
    assert jnp.allclose(proj, ref_proj, atol=1e-4, rtol=1e-4)
    assert jnp.allclose(x_out, x)

    # --- Check 2: bf16 matmuls (v6e/v7x fast path), 2-step H reduction.
    B, d_in, H, O = 16, 256, 512, 256
    x, w1, b1, gamma, beta, w2 = _make_inputs(k2, B, d_in, H, O, jnp.bfloat16)
    out, proj, x_out = simclr_sender_forward(x, w1, b1, gamma, beta, w2, tile_h=256)
    jax.block_until_ready((out, proj, x_out))
    ref_out, ref_proj, _ = _reference_forward(x, w1, b1, gamma, beta, w2,
                                              proj_matmul_dtype=jnp.bfloat16)
    assert jnp.allclose(out.astype(jnp.float32), ref_out, atol=2e-2, rtol=2e-2)
    assert jnp.allclose(proj, ref_proj, atol=2e-2, rtol=2e-2)
    assert jnp.allclose(x_out.astype(jnp.float32), x.astype(jnp.float32))

    print("KERNEL_OK")
</pallas_src>

<mosaic_0001>
module attributes {stable_mosaic.version = 11 : i64} {
  func.func @_simclr_sender_kernel(%arg0: i32, %arg1: memref<8x128xf32, #tpu.memory_space<vmem>>, %arg2: memref<128x128xf32, #tpu.memory_space<vmem>>, %arg3: memref<3x128xf32, #tpu.memory_space<vmem>>, %arg4: memref<128x128xf32, #tpu.memory_space<vmem>>, %arg5: memref<8x128xf32, #tpu.memory_space<vmem>>, %arg6: memref<8x128xf32, #tpu.memory_space<vmem>>, %arg7: memref<8x128xf32, #tpu.memory_space<vmem>>) attributes {dimension_semantics = [#tpu.dimension_semantics<arbitrary>], iteration_bounds = array<i64: 2>, scalar_prefetch = 0 : i64, scratch_operands = 1 : i64, tpu.core_type = #tpu.core_type<tc>, window_params = [{pipeline_mode = #tpu.pipeline_mode<synchronous>, transform_indices = @transform_0, window_bounds = array<i64: 8, 128>}, {transform_indices = @transform_1, window_bounds = array<i64: 128, 128>}, {transform_indices = @transform_2, window_bounds = array<i64: 3, 128>}, {transform_indices = @transform_3, window_bounds = array<i64: 128, 128>}, {pipeline_mode = #tpu.pipeline_mode<synchronous>, transform_indices = @transform_4, window_bounds = array<i64: 8, 128>}, {transform_indices = @transform_5, window_bounds = array<i64: 8, 128>}]} {
    %c0_i32 = arith.constant 0 : i32
    %0 = arith.cmpi eq, %arg0, %c0_i32 : i32
    %1 = arith.extui %0 : i1 to i32
    %c0_i32_0 = arith.constant 0 : i32
    %2 = arith.cmpi ne, %1, %c0_i32_0 : i32
    scf.if %2 {
      %cst_22 = arith.constant 0.000000e+00 : f32
      %42 = vector.broadcast %cst_22 : f32 to vector<8x128xf32>
      %c0_23 = arith.constant 0 : index
      %c0_24 = arith.constant 0 : index
      %43 = vector.load %arg7[%c0_23, %c0_24] : memref<8x128xf32, #tpu.memory_space<vmem>>, vector<8x128xf32>
      tpu.vector_store %arg7[%c0_23, %c0_24], %42 {strides = array<i32>} : memref<8x128xf32, #tpu.memory_space<vmem>>, vector<8x128xf32>,
    } else {
    }
    %c0 = arith.constant 0 : index
    %c0_1 = arith.constant 0 : index
    %3 = vector.load %arg1[%c0, %c0_1] : memref<8x128xf32, #tpu.memory_space<vmem>>, vector<8x128xf32>
    %c0_2 = arith.constant 0 : index
    %c0_3 = arith.constant 0 : index
    %4 = vector.load %arg2[%c0_2, %c0_3] : memref<128x128xf32, #tpu.memory_space<vmem>>, vector<128x128xf32>
    %cst = arith.constant dense<0.000000e+00> : vector<8x128xf32>
    %5 = tpu.matmul %3, %4, %cst {dimension_numbers = #tpu.dot_dimension_numbers<[1], [1], [0], [0], [0, 0, 1, 0], [], []>} : vector<8x128xf32>, vector<128x128xf32>, vector<8x128xf32> -> vector<8x128xf32>
    %c0_4 = arith.constant 0 : index
    %c0_5 = arith.constant 0 : index
    %6 = vector.load %arg3[%c0_4, %c0_5] : memref<3x128xf32, #tpu.memory_space<vmem>>, vector<3x128xf32>
    %7 = vector.extract_strided_slice %6 {offsets = [0, 0], sizes = [1, 128], strides = [1, 1]} : vector<3x128xf32> to vector<1x128xf32>
    %8 = vector.broadcast %7 : vector<1x128xf32> to vector<8x128xf32>
    %9 = arith.addf %5, %8 : vector<8x128xf32>
    %cst_6 = arith.constant dense<0.000000e+00> : vector<128xf32>
    %10 = vector.multi_reduction <add>, %9, %cst_6 [0] : vector<8x128xf32> to vector<128xf32>
    %11 = vector.shape_cast %10 : vector<128xf32> to vector<1x128xf32>
    %cst_7 = arith.constant 1.250000e-01 : f32
    %12 = vector.broadcast %cst_7 : f32 to vector<1x128xf32>
    %13 = arith.mulf %11, %12 : vector<1x128xf32>
    %14 = vector.broadcast %13 : vector<1x128xf32> to vector<8x128xf32>
    %15 = arith.subf %9, %14 : vector<8x128xf32>
    %16 = arith.mulf %15, %15 : vector<8x128xf32>
    %cst_8 = arith.constant dense<0.000000e+00> : vector<128xf32>
    %17 = vector.multi_reduction <add>, %16, %cst_8 [0] : vector<8x128xf32> to vector<128xf32>
    %18 = vector.shape_cast %17 : vector<128xf32> to vector<1x128xf32>
    %cst_9 = arith.constant 1.250000e-01 : f32
    %19 = vector.broadcast %cst_9 : f32 to vector<1x128xf32>
    %20 = arith.mulf %18, %19 : vector<1x128xf32>
    %21 = vector.extract_strided_slice %6 {offsets = [1, 0], sizes = [1, 128], strides = [1, 1]} : vector<3x128xf32> to vector<1x128xf32>
    %cst_10 = arith.constant 9.99999974E-6 : f32
    %22 = vector.broadcast %cst_10 : f32 to vector<1x128xf32>
    %23 = arith.addf %20, %22 : vector<1x128xf32>
    %24 = math.rsqrt %23 : vector<1x128xf32>
    %25 = arith.mulf %21, %24 : vector<1x128xf32>
    %26 = vector.broadcast %25 : vector<1x128xf32> to vector<8x128xf32>
    %27 = arith.mulf %15, %26 : vector<8x128xf32>
    %28 = vector.extract_strided_slice %6 {offsets = [2, 0], sizes = [1, 128], strides = [1, 1]} : vector<3x128xf32> to vector<1x128xf32>
    %29 = vector.broadcast %28 : vector<1x128xf32> to vector<8x128xf32>
    %30 = arith.addf %27, %29 : vector<8x128xf32>
    %cst_11 = arith.constant 0.000000e+00 : f32
    %31 = vector.broadcast %cst_11 : f32 to vector<8x128xf32>
    %32 = arith.maximumf %30, %31 : vector<8x128xf32>
    %c0_12 = arith.constant 0 : index
    %c0_13 = arith.constant 0 : index
    %33 = vector.load %arg6[%c0_12, %c0_13] : memref<8x128xf32, #tpu.memory_space<vmem>>, vector<8x128xf32>
    tpu.vector_store %arg6[%c0_12, %c0_13], %32 {strides = array<i32>} : memref<8x128xf32, #tpu.memory_space<vmem>>, vector<8x128xf32>,
    %c0_14 = arith.constant 0 : index
    %c0_15 = arith.constant 0 : index
    %34 = vector.load %arg7[%c0_14, %c0_15] : memref<8x128xf32, #tpu.memory_space<vmem>>, vector<8x128xf32>
    %c0_16 = arith.constant 0 : index
    %c0_17 = arith.constant 0 : index
    %35 = vector.load %arg4[%c0_16, %c0_17] : memref<128x128xf32, #tpu.memory_space<vmem>>, vector<128x128xf32>
    %cst_18 = arith.constant dense<0.000000e+00> : vector<8x128xf32>
    %36 = tpu.matmul %32, %35, %cst_18 {dimension_numbers = #tpu.dot_dimension_numbers<[1], [1], [0], [0], [0, 0, 1, 0], [], []>} : vector<8x128xf32>, vector<128x128xf32>, vector<8x128xf32> -> vector<8x128xf32>
    %37 = arith.addf %34, %36 : vector<8x128xf32>
    %c0_19 = arith.constant 0 : index
    %c0_20 = arith.constant 0 : index
    %38 = vector.load %arg7[%c0_19, %c0_20] : memref<8x128xf32, #tpu.memory_space<vmem>>, vector<8x128xf32>
    tpu.vector_store %arg7[%c0_19, %c0_20], %37 {strides = array<i32>} : memref<8x128xf32, #tpu.memory_space<vmem>>, vector<8x128xf32>,
    %c1_i32 = arith.constant 1 : i32
    %39 = arith.cmpi eq, %arg0, %c1_i32 : i32
    %40 = arith.extui %39 : i1 to i32
    %c0_i32_21 = arith.constant 0 : i32
    %41 = arith.cmpi ne, %40, %c0_i32_21 : i32
    scf.if %41 {
      %c0_22 = arith.constant 0 : index
      %c0_23 = arith.constant 0 : index
      %42 = vector.load %arg7[%c0_22, %c0_23] : memref<8x128xf32, #tpu.memory_space<vmem>>, vector<8x128xf32>
      %c0_24 = arith.constant 0 : index
      %c0_25 = arith.constant 0 : index
      %43 = vector.load %arg5[%c0_24, %c0_25] : memref<8x128xf32, #tpu.memory_space<vmem>>, vector<8x128xf32>
      tpu.vector_store %arg5[%c0_24, %c0_25], %42 {strides = array<i32>} : memref<8x128xf32, #tpu.memory_space<vmem>>, vector<8x128xf32>,
    } else {
    }
    return
  }
  func.func @transform_0(%arg0: i32) -> (i32, i32) {
    %c0_i32 = arith.constant 0 : i32
    %c0_i32_0 = arith.constant 0 : i32
    %c0_i32_1 = arith.constant 0 : i32
    return %c0_i32, %c0_i32_0 : i32, i32
  }
  func.func @transform_1(%arg0: i32) -> (i32, i32) {
    %c0_i32 = arith.constant 0 : i32
    %c0_i32_0 = arith.constant 0 : i32
    return %arg0, %c0_i32 : i32, i32
  }
  func.func @transform_2(%arg0: i32) -> (i32, i32) {
    %c0_i32 = arith.constant 0 : i32
    %c0_i32_0 = arith.constant 0 : i32
    return %c0_i32, %arg0 : i32, i32
  }
  func.func @transform_3(%arg0: i32) -> (i32, i32) {
    %c0_i32 = arith.constant 0 : i32
    %c0_i32_0 = arith.constant 0 : i32
    return %c0_i32, %arg0 : i32, i32
  }
  func.func @transform_4(%arg0: i32) -> (i32, i32) {
    %c0_i32 = arith.constant 0 : i32
    %c0_i32_0 = arith.constant 0 : i32
    %c0_i32_1 = arith.constant 0 : i32
    return %c0_i32, %c0_i32_0 : i32, i32
  }
  func.func @transform_5(%arg0: i32) -> (i32, i32) {
    %c0_i32 = arith.constant 0 : i32
    %c0_i32_0 = arith.constant 0 : i32
    return %c0_i32, %arg0 : i32, i32
  }
}

</mosaic_0001>

<bundles_post_ra>
// kernel: tpu_custom_call.1
= control target key start
LH: loop header
LB: loop body
LE: loop exit
PB: predicated region body
PF: predicated region fallthrough
CT: control target
= control target key end

     0   :  { %s1257_s0 = inlined_call_operand.hbm [shape: f32[8,128], index: 0, kind: input, shape index: {}]   ;;  %s1258_s1 = inlined_call_operand.hbm [shape: f32[256,128], index: 1, kind: input, shape index: {}]   ;;  %s1259_s2 = inlined_call_operand.hbm [shape: f32[3,256], index: 2, kind: input, shape index: {}]   ;;  %s1260_s3 = inlined_call_operand.hbm [shape: f32[128,256], index: 3, kind: input, shape index: {}]   ;;  %s1261_s4 = inlined_call_operand.hbm [shape: f32[8,128], index: 4, kind: output, shape index: {0}]   ;;  %s1262_s5 = inlined_call_operand.hbm [shape: f32[8,256], index: 5, kind: output, shape index: {1}]  }
   0x1   :  { %1269 = sst [smem:[#allocation22_spill]] %s1257_s0 }
   0x2   :  { %1270 = sst [smem:[#allocation23_spill]] %s1258_s1 }
   0x3   :  { %11 = vsyncpa [#allocation4], 0 }
   0x4   :  { %12 = vsyncpa [#allocation7], 0 }
   0x5   :  { %14 = vsyncpa [#allocation7 + $0x1], 0 }
   0x6   :  { %15 = vsyncpa [#allocation10], 0 }
   0x7   :  { %17 = vsyncpa [#allocation10 + $0x1], 0 }
   0x8   :  { %18 = vsyncpa [#allocation5], 0 }
   0x9   :  { %19 = vsyncpa [#allocation13], 0 }
   0xa   :  { %21 = vsyncpa [#allocation13 + $0x1], 0  ;;  %s997_s18 = smov 0   ;;  %s999_s19 = smov 0  }
   0xb   :  { %s1001_s20 = smov 0   ;;  %s1003_s21 = smov 0  }
   0xc LB: > { %1271 = sst [smem:[#allocation19_spill]] %s955_s20  ;;  %s1018_s22 = sadd.s32 1, %s959_s21   ;;  %s959_s21 = sphi %s1003_s21, %s1288_s21   ;;  %s955_s20 = sphi %s1001_s20, %s1290_s20   ;;  %s951_s19 = sphi %s999_s19, %s1292_s19   ;;  %s947_s18 = sphi %s997_s18, %s1291_s18  }
   0xd   : > { %1272 = sst [smem:[#allocation20_spill]] %s1018_s22  ;;  %s55_s23 = sadd.s32 1, %s955_s20 }
   0xe   : > { %s52_s24 = ssub.s32 %s959_s21, %s1018_s22  ;;  %p62_p0 = scmp.ne.s32.totalorder %s955_s20, %s951_s19 }
   0xf   : > { %p53_p1 = scmp.eq.s32.totalorder %s52_s24, 0  ;;  %p63_p2 = scmp.eq.s32.totalorder %s959_s21, 0 }
  0x10   : > { %p688_p4 = scmp.lt.s32.totalorder %s959_s21, 2  ;;  %s203_s26 = sand.u32 1, %s959_s21  }
  0x11   : > { %s1029_s25 = scalar_select %p53_p1, %s955_s20, %s55_s23  }
  0x12   : > { %p64_p5 = por %p63_p2, %p62_p0  ;;  %s1036_s27 = sand.u32 1, %s955_s20  }
  0x13   : > { %1273 = sst [smem:[#allocation21_spill]] %s1029_s25  ;;  %s631_s28 = sshll.u32 %s1036_s27, 7 }
  0x14   : > { %s652_s29 = sshll.u32 %s959_s21, 7  ;;  %s1274_s1 = sld [smem:[#allocation23_spill]] }
  0x15   : > { %s207_s9 = scalar_lea.vmem [#allocation6], %s631_s28  ;;  %p1045_p6 = pnand %p688_p4, %p64_p5 }
  0x16   : > { %s215_s10 = sshll.u32 %s207_s9, 4  ;;  %s248_s12 = scalar_lea.vmem [#allocation9], %s631_s28  ;;  %s216_s10 = int_to_ptr.vmem [resolvable:$true] %s215_s10 }
  0x17   : > { %s255_s13 = sshll.u32 %s248_s12, 4  ;;  %s1049_s14 = scalar_lea.sflag [#allocation7], %s203_s26  ;;  %s1068_s13 = int_to_ptr.vmem [resolvable:$true] %s255_s13 }
  0x18   : > { %p737_p8 = pneg %p1045_p6 }
  0x1a   : > { %s212_s7 = scalar_lea.hbm %s1274_s1, %s652_s29  ;;  %s740_s24 = scalar_lea.hbm %s1274_s1, 256 }
  0x1b   : > { %s213_s8 = sshll.u32 %s212_s7, 4  ;;  %s214_s8 = int_to_ptr.hbm [resolvable:$true] %s213_s8 }
  0x1c   : > { %s733_s15 = sshra.s32 %s214_s8, 4  ;;  %s734_s15 = int_to_ptr.hbm [resolvable:$true] %s733_s15 }
  0x1d   : > { %s735_s16 = scalar_lea.hbm %s734_s15, 128  ;;  %p741_p11 = scmp.lt.s32.totalorder %s734_s15, %s1274_s1 }
  0x1e   : > { %p736_p7 = scmp.ne.s32.totalorder %s734_s15, %s735_s16  ;;  %p742_p12 = scmp.lt.s32.totalorder %s740_s24, %s735_s16 }
  0x20   : > { %p738_p9 = pnand %p737_p8, %p736_p7  ;;  %p743_p13 = por %p742_p12, %p741_p11 }
  0x22   : > { %p739_p10 = pneg %p738_p9 }
  0x24   : > { %p744_p1 = pnand %p743_p13, %p739_p10 }
  0x26   : > { %747 = shalt.err (!%p744_p1)
}
  0x27   : > { %s1263_s26 = smov 128   ;;  %s1264_s28 = smov 8  }
  0x28   : > { %676 = dma.hbm_to_vmem [thread:$0]  (!%p1045_p6), %s214_s8, 2048, %s216_s10, %s1049_s14, %s1263_s26, %s1263_s26, %s1264_s28  }
  0x29   : > { %s1071_s6 = sadd.s32 4294967295, %s959_s21   ;;  %s627_s7 = sadd.s32 4294967294, %s959_s21  }
  0x2a   : > { %p68_p2 = scmp.ne.s32.totalorder %s951_s19, %s947_s18  ;;  %p69_p4 = scmp.eq.s32.totalorder %s1071_s6, 0 }
  0x2b   : > { %p1268_p5 = scmp.eq.s32.totalorder %s1071_s6, 1  ;;  %p171_p7 = scmp.eq.s32.totalorder %s627_s7, 1 }
  0x2c   : > { %p628_p9 = scmp.ge.s32.totalorder %s959_s21, 1  ;;  %p1081_p10 = por %p69_p4, %p68_p2 }
  0x2d   : > { %p1090_p11 = por %p1268_p5, %p62_p0  ;;  %p1094_p12 = por %p171_p7, %p68_p2 }
  0x2e   : > { %p178_p13 = scmp.lt.s32.totalorder %s959_s21, 3  ;;  %s1279_s0 = sld [smem:[#allocation22_spill]] }
  0x2f   : > { %s634_s23 = sshll.u32 %s1036_s27, 2  ;;  %s963_s24 = smov [#allocation3]  }
  0x30   : > { %p1103_p3 = pnand %p628_p9, %p178_p13  ;;  %s192_s29 = sshll.u32 %s963_s24, 4  ;;  %s193_s29 = int_to_ptr.vmem [resolvable:$true] %s192_s29 }
  0x31   : > { %s635_s30 = sshll.u32 %s959_s21, 2  ;;  %s229_s15 = scalar_lea.vmem [#allocation8], %s634_s23 }
  0x32   : > { %p669_p0 = pneg %p1103_p3  ;;  %s233_s12 = scalar_lea.hbm %s1259_s2, %s635_s30 }
  0x33   : > { %s237_s28 = sshll.u32 %s229_s15, 4  ;;  %s800_s22 = scalar_lea.hbm %s1259_s2, 8  ;;  %s238_s28 = int_to_ptr.vmem [resolvable:$true] %s237_s28 }
  0x34   : > { %s190_s16 = sshll.u32 %s1279_s0, 4  ;;  %p670_p2 = pnand %p669_p0, %p69_p4  ;;  %s191_s16 = int_to_ptr.hbm [resolvable:$true] %s190_s16 }
  0x35   : > { %s235_s0 = sshll.u32 %s233_s12, 4  ;;  %s236_s0 = int_to_ptr.hbm [resolvable:$true] %s235_s0 }
  0x36   : > { %672 = dma.hbm_to_vmem [thread:$0]  (!%p670_p2), %s191_s16, 128, %s193_s29, [#allocation4]  }
  0x37   : > { %s793_s1 = sshra.s32 %s236_s0, 4  ;;  %s794_s1 = int_to_ptr.hbm [resolvable:$true] %s793_s1 }
  0x38   : > { %s795_s25 = scalar_lea.hbm %s794_s1, 4  ;;  %p801_p0 = scmp.lt.s32.totalorder %s794_s1, %s1259_s2 }
  0x39   : > { %p796_p7 = scmp.ne.s32.totalorder %s794_s1, %s795_s25  ;;  %p802_p5 = scmp.lt.s32.totalorder %s800_s22, %s795_s25 }
  0x3b   : > { %p798_p9 = pnand %p796_p7, %p737_p8  ;;  %p803_p2 = por %p802_p5, %p801_p0 }
  0x3d   : > { %p799_p13 = pneg %p798_p9 }
  0x3f   : > { %p804_p1 = pnand %p803_p2, %p799_p13 }
  0x41   : > { %807 = shalt.err (!%p804_p1)
}
  0x42   : > { %679 = dma.hbm_to_vmem [thread:$0]  (!%p1045_p6), %s236_s0, 64, %s238_s28, %s1049_s14  }
  0x43   : > { %s637_s16 = sshll.u32 %s959_s21, 3  ;;  %s245_s12 = scalar_lea.sflag [#allocation10], %s1036_s27 }
  0x44   : > { %s252_s20 = scalar_lea.hbm %s1260_s3, %s637_s16  ;;  %s830_s0 = scalar_lea.hbm %s1260_s3, 256 }
  0x45   : > { %s253_s7 = sshll.u32 %s252_s20, 4  ;;  %s254_s7 = int_to_ptr.hbm [resolvable:$true] %s253_s7 }
  0x46   : > { %s823_s1 = sshra.s32 %s254_s7, 4  ;;  %s824_s1 = int_to_ptr.hbm [resolvable:$true] %s823_s1 }
  0x47   : > { %s825_s22 = scalar_lea.hbm %s824_s1, 128  ;;  %p831_p9 = scmp.lt.s32.totalorder %s824_s1, %s1260_s3 }
  0x48   : > { %p826_p5 = scmp.ne.s32.totalorder %s824_s1, %s825_s22  ;;  %p832_p13 = scmp.lt.s32.totalorder %s830_s0, %s825_s22 }
  0x4a   : > { %p828_p1 = pnand %p826_p5, %p737_p8  ;;  %p833_p0 = por %p832_p13, %p831_p9 }
  0x4c   : > { %p829_p7 = pneg %p828_p1 }
  0x4e   : > { %p834_p2 = pnand %p833_p0, %p829_p7 }
  0x50   : > { %837 = shalt.err (!%p834_p2)
}
  0x51   : > { %s964_s27 = smov 256   ;;  %s1281_s24 = smov 8  }
  0x52   : > { %s1282_s26 = smov 128   ;;  %267 = sbr.rel (%p1103_p3) target bundleno = 518 (0x206), region = 36 }
  0x53   : > { %682 = dma.hbm_to_vmem [thread:$0]  (!%p1045_p6), %s254_s7, 2048, %s1068_s13, %s245_s12, %s964_s27, %s1282_s26, %s1281_s24  }
  0x57   : > { %926 = dma.done.wait (%p69_p4), [#allocation4], 128  }
  0x58   : > { %928 = vsyncadd (%p69_p4), [#allocation4], 4294967168  ;;  %s274_s30 = sand.u32 1, %s1071_s6   ;;  %s1155_s16 = sand.u32 1, %s951_s19  }
  0x59   : > { %s640_s11 = sshll.u32 %s1155_s16, 7  ;;  %s275_s23 = scalar_lea.sflag [#allocation7], %s274_s30 }
  0x5a   : > { %s1158_s29 = scalar_lea.vmem [#allocation6], %s640_s11 }
  0x5b   : > { %930 = dma.done.wait (%p1081_p10), %s275_s23, 2112  }
  0x5c   : > { %932 = vsyncadd (%p1081_p10), %s275_s23, 4294965184  ;;  %s641_s13 = sshll.u32 %s1155_s16, 2  ;;  %s295_s20 = scalar_lea.sflag [#allocation10], %s1155_s16 }
  0x5d   : > { %s1165_s17 = scalar_lea.vmem [#allocation8], %s641_s13  ;;  %s1168_s7 = scalar_lea.vmem [#allocation9], %s640_s11 }
  0x5e   : > { %934 = dma.done.wait (%p1081_p10), %s295_s20, 2048  }
  0x5f   : > { %936 = vsyncadd (%p1081_p10), %s295_s20, 4294965248  ;;  %s643_s12 = sshll.u32 %s1155_s16, 3  ;;  %p1283_p3 = scmp.ne.s32.totalorder %s1071_s6, 0 }
  0x60   : > { %s1175_s1 = scalar_lea.vmem [#allocation12], %s643_s12 }
  0x61   : > { %340 = sbr.rel (%p1283_p3) target bundleno = 104 (0x68), region = 56 }
  0x66   : > { %v965_v0 = vmov 0.0  }
  0x67   : > { %341 = vst [vmem:[#allocation2] sm:$0xff] %v965_v0 }
  0x68 PF: > { %v358_v1 = vld [vmem:[%s1158_s29 + $0x78] sm:$0xff]  ;;  %v357_v2 = vld [vmem:[%s1158_s29 + $0x70] sm:$0xff]  ;;  %v356_v3 = vld [vmem:[%s1158_s29 + $0x68] sm:$0xff]  ;;  %p645_p6 = scmp.ne.s32.totalorder %s1071_s6, 1 }
  0x69   : > { %361 = vmatpush.xpose.msra.mxu0 %v358_v1  ;;  %v355_v4 = vld [vmem:[%s1158_s29 + $0x60] sm:$0xff]  ;;  %v354_v5 = vld [vmem:[%s1158_s29 + $0x58] sm:$0xff]  ;;  %v353_v6 = vld [vmem:[%s1158_s29 + $0x50] sm:$0xff] }
  0x6a   : > { %v352_v7 = vld [vmem:[%s1158_s29 + $0x48] sm:$0xff]  ;;  %v351_v8 = vld [vmem:[%s1158_s29 + $0x40] sm:$0xff]  ;;  %v350_v9 = vld [vmem:[%s1158_s29 + $0x38] sm:$0xff] }
  0x6b   : > { %v349_v10 = vld [vmem:[%s1158_s29 + $0x30] sm:$0xff]  ;;  %v348_v11 = vld [vmem:[%s1158_s29 + $0x28] sm:$0xff]  ;;  %v347_v12 = vld [vmem:[%s1158_s29 + $0x20] sm:$0xff] }
  0x6c   : > { %v346_v13 = vld [vmem:[%s1158_s29 + $0x18] sm:$0xff]  ;;  %v345_v14 = vld [vmem:[%s1158_s29 + $0x10] sm:$0xff]  ;;  %v344_v15 = vld [vmem:[%s1158_s29 + $0x8] sm:$0xff] }
  0x6d   : > { %362 = vmatpush.xpose.msra.mxu0 %v357_v2  ;;  %v343_v16 = vld [vmem:[%s1158_s29] sm:$0xff]  ;;  %v342_v17 = vld [vmem:[#allocation3] sm:$0xff]  ;;  %v429_v20 = vld [vmem:[%s1168_s7 + $0x68] sm:$0xff] }
  0x6e   : > { %v431_v18 = vld [vmem:[%s1168_s7 + $0x78] sm:$0xff]  ;;  %v430_v19 = vld [vmem:[%s1168_s7 + $0x70] sm:$0xff]  ;;  %v428_v21 = vld [vmem:[%s1168_s7 + $0x60] sm:$0xff] }
  0x6f   : > { %432 = vmatpush.xpose.msra.mxu1 %v431_v18  ;;  %v427_v22 = vld [vmem:[%s1168_s7 + $0x58] sm:$0xff]  ;;  %v426_v23 = vld [vmem:[%s1168_s7 + $0x50] sm:$0xff]  ;;  %v425_v24 = vld [vmem:[%s1168_s7 + $0x48] sm:$0xff] }
  0x70   : > { %v359_v25 = vld [vmem:[%s1165_s17] sm:$0x7]  ;;  %v424_v27 = vld [vmem:[%s1168_s7 + $0x40] sm:$0xff]  ;;  %v422_v33 = vld [vmem:[%s1168_s7 + $0x30] sm:$0xff] }
  0x71   : > { %363 = vmatpush.xpose.msra.mxu0 %v356_v3  ;;  %v360_v26 = vperm.slane %v359_v25, 0  ;;  %v423_v30 = vld [vmem:[%s1168_s7 + $0x38] sm:$0xff]  ;;  %v421_v35 = vld [vmem:[%s1168_s7 + $0x28] sm:$0xff]  ;;  %v420_v38 = vld [vmem:[%s1168_s7 + $0x20] sm:$0xff]  ;;  %v411_v0 = vperm.slane %v359_v25, 2 }
  0x72   : > { %v419_v41 = vld [vmem:[%s1168_s7 + $0x18] sm:$0xff]  ;;  %v418_v44 = vld [vmem:[%s1168_s7 + $0x10] sm:$0xff]  ;;  %v417_v47 = vld [vmem:[%s1168_s7 + $0x8] sm:$0xff] }
  0x73   : > { %433 = vmatpush.xpose.msra.mxu1 %v430_v19  ;;  %v416_v50 = vld [vmem:[%s1168_s7] sm:$0xff] }
  0x75   : > { %364 = vmatpush.xpose.msra.mxu0 %v355_v4  ;;  %v415_v4 = vld [vmem:[#allocation2] sm:$0xff] }
  0x77   : > { %434 = vmatpush.xpose.msra.mxu1 %v429_v20 }
  0x79   : > { %365 = vmatpush.xpose.msra.mxu0 %v354_v5 }
  0x7b   : > { %435 = vmatpush.xpose.msra.mxu1 %v428_v21 }
  0x7d   : > { %366 = vmatpush.xpose.msra.mxu0 %v353_v6 }
  0x7f   : > { %436 = vmatpush.xpose.msra.mxu1 %v427_v22 }
  0x81   : > { %367 = vmatpush.xpose.msra.mxu0 %v352_v7 }
  0x83   : > { %437 = vmatpush.xpose.msra.mxu1 %v426_v23 }
  0x85   : > { %368 = vmatpush.xpose.msra.mxu0 %v351_v8 }
  0x87   : > { %438 = vmatpush.xpose.msra.mxu1 %v425_v24 }
  0x89   : > { %369 = vmatpush.xpose.msra.mxu0 %v350_v9 }
  0x8b   : > { %439 = vmatpush.xpose.msra.mxu1 %v424_v27 }
  0x8d   : > { %370 = vmatpush.xpose.msra.mxu0 %v349_v10 }
  0x8f   : > { %440 = vmatpush.xpose.msra.mxu1 %v423_v30 }
  0x91   : > { %371 = vmatpush.xpose.msra.mxu0 %v348_v11 }
  0x93   : > { %441 = vmatpush.xpose.msra.mxu1 %v422_v33 }
  0x95   : > { %372 = vmatpush.xpose.msra.mxu0 %v347_v12 }
  0x97   : > { %442 = vmatpush.xpose.msra.mxu1 %v421_v35 }
  0x99   : > { %373 = vmatpush.xpose.msra.mxu0 %v346_v13 }
  0x9b   : > { %443 = vmatpush.xpose.msra.mxu1 %v420_v38 }
  0x9d   : > { %374 = vmatpush.xpose.msra.mxu0 %v345_v14 }
  0x9f   : > { %444 = vmatpush.xpose.msra.mxu1 %v419_v41 }
  0xa1   : > { %375 = vmatpush.xpose.msra.mxu0 %v344_v15 }
  0xa3   : > { %445 = vmatpush.xpose.msra.mxu1 %v418_v44 }
  0xa5   : > { %376 = vmatpush.xpose.msra.mxu0 %v343_v16 }
  0xa7   : > { %446 = vmatpush.xpose.msra.mxu1 %v417_v47 }
  0xa8   : > { %377 = vmatmul.f32.vlgmr.msra.gmra.mxu0 %v342_v17 }
  0xab   : > { %447 = vmatpush.xpose.msra.mxu1 %v416_v50 }
 0x125   : > { %v378_v28 = vpop.f32.mrf.mxu0 }
 0x126   : > { %v379_v29 = vadd.f32 %v378_v28, %v360_v26 }
 0x128   : > { %v381_v31 = vrot.slane %v379_v29, 4 }
 0x12a   : > { %v382_v32 = vadd.f32 %v381_v31, %v379_v29 }
 0x12c   : > { %v383_v34 = vrot.slane %v382_v32, 2 }
 0x12e   : > { %v384_v36 = vadd.f32 %v383_v34, %v382_v32 }
 0x130   : > { %v385_v37 = vrot.slane %v384_v36, 1 }
 0x132   : > { %v386_v39 = vadd.f32 %v385_v37, %v384_v36 }
 0x134   : > { %v387_v40 = vmul.f32 0.125, %v386_v39 }
 0x136   : > { %v388_v42 = vsub.f32 %v379_v29, %v387_v40 }
 0x138   : > { %v389_v43 = vmul.f32 %v388_v42, %v388_v42 }
 0x13a   : > { %v390_v45 = vrot.slane %v389_v43, 4 }
 0x13c   : > { %v391_v46 = vadd.f32 %v390_v45, %v389_v43 }
 0x13e   : > { %v392_v48 = vrot.slane %v391_v46, 2 }
 0x140   : > { %v393_v49 = vadd.f32 %v392_v48, %v391_v46 }
 0x142   : > { %v394_v51 = vrot.slane %v393_v49, 1 }
 0x144   : > { %v395_v52 = vadd.f32 %v394_v51, %v393_v49 }
 0x146   : > { %v396_v53 = vmul.f32 0.125, %v395_v52 }
 0x148   : > { %v397_v54 = vadd.f32 1e-05, %v396_v53 }
 0x14a   : > { %731 = vrsqrt.f32 %v397_v54  ;;  %vm404_vm1 = vweird.f32 %v397_v54 }
 0x150   : > { %v732_v55 = vpop.eup %731 }
 0x151   : > { %v399_v56 = vmul.f32 %v732_v55, %v397_v54  ;;  %vm405_vm0 = vweird.f32 %v732_v55 }
 0x152   : > { %vm406_vm2 = vmor %vm404_vm1, %vm405_vm0 }
 0x153   : > { %v400_v57 = vmul.f32 %v732_v55, %v399_v56 }
 0x155   : > { %v401_v58 = vmul.f32 0.5, %v400_v57 }
 0x157   : > { %v402_v59 = vsub.f32 1.5, %v401_v58 }
 0x159   : > { %v403_v60 = vmul.f32 %v732_v55, %v402_v59 }
 0x15b   : > { %v407_v61 = vsel %vm406_vm2, %v732_v55, %v403_v60 }
 0x15c   : > { %v408_v62 = vmul.f32 %v407_v61, %v359_v25 }
 0x15e   : > { %v409_v63 = vperm.slane %v408_v62, 1 }
 0x160   : > { %v410_v1 = vmul.f32 %v409_v63, %v388_v42 }
 0x162   : > { %v412_v2 = vadd.f32 %v411_v0, %v410_v1 }
 0x164   : > { %v413_v3 = vmax.f32 %v412_v2, 0.0 }
 0x166   : > { %414 = vst [vmem:[%s1175_s1] sm:$0xff] %v413_v3  ;;  %448 = vmatmul.f32.vlgmr.msra.gmra.mxu1 %v413_v3 }
 0x1e2   : > { %457 = sbr.rel (%p645_p6) target bundleno = 495 (0x1ef), region = 60 }
 0x1e3   : > { %v449_v5 = vpop.f32.mrf.mxu1 }
 0x1e4   : > { %v452_v6 = vadd.f32 %v449_v5, %v415_v4 }
 0x1e6   : > { %453 = vst [vmem:[#allocation2] sm:$0xff] %v452_v6 }
 0x1ed   : > { %v458_v7 = vld [vmem:[#allocation2] sm:$0xff] }
 0x1ee   : > { %459 = vst [vmem:[#allocation11] sm:$0xff] %v458_v7 }
 0x1ef PF: > { %s473_s25 = sshll.u32 %s1261_s4, 4  ;;  %s966_s15 = smov [#allocation11]   ;;  %s474_s25 = int_to_ptr.hbm [resolvable:$true] %s473_s25 }
 0x1f0   : > { %s471_s0 = sshll.u32 %s966_s15, 4  ;;  %p1284_p8 = scmp.eq.s32.totalorder %s1071_s6, 1  ;;  %s472_s0 = int_to_ptr.vmem [resolvable:$true] %s471_s0 }
 0x1f1   : > { %s648_s14 = sshll.u32 %s1071_s6, 3  ;;  %s485_s28 = sshll.u32 %s1175_s1, 4  ;;  %s486_s28 = int_to_ptr.vmem [resolvable:$true] %s485_s28 }
 0x1f2   : > { %664 = dma.vmem_to_hbm [thread:$0]  (%p1284_p8), %s472_s0, 128, %s474_s25, [#allocation5]  }
 0x1f3   : > { %s483_s26 = scalar_lea.hbm %s1262_s5, %s648_s14  ;;  %s461_s11 = scalar_lea.sflag [#allocation13], %s1155_s16 }
 0x1f4   : > { %s487_s30 = sshll.u32 %s483_s26, 4  ;;  %s901_s20 = scalar_lea.hbm %s1262_s5, 16  ;;  %s488_s30 = int_to_ptr.hbm [resolvable:$true] %s487_s30 }
 0x1f5   : > { %s895_s23 = sshra.s32 %s488_s30, 4  ;;  %s896_s23 = int_to_ptr.hbm [resolvable:$true] %s895_s23 }
 0x1f6   : > { %s897_s29 = scalar_lea.hbm %s896_s23, 8  ;;  %p902_p1 = scmp.lt.s32.totalorder %s896_s23, %s1262_s5 }
 0x1f7   : > { %p898_p4 = scmp.ne.s32.totalorder %s896_s23, %s897_s29  ;;  %p903_p7 = scmp.lt.s32.totalorder %s901_s20, %s897_s29 }
 0x1f9   : > { %p899_p10 = pnand %p898_p4, %p1090_p11  ;;  %p904_p9 = por %p903_p7, %p902_p1 }
 0x1fb   : > { %p900_p5 = pneg %p899_p10 }
 0x1fd   : > { %p905_p13 = pnand %p904_p9, %p900_p5 }
 0x1ff   : > { %908 = shalt.err (!%p905_p13)
}
 0x200   : > { %665 = dma.vmem_to_hbm [thread:$0]  (%p1090_p11), %s486_s28, 128, %s488_s30, %s461_s11  }
 0x201   : > { %p1285_p0 = pmov %p1284_p8 }
 0x203   : > { %938 = dma.done.wait (%p1285_p0), [#allocation5], 128   ;;  %p1286_p2 = pmov %p1285_p0 }
 0x205   : > { %940 = vsyncadd (%p1286_p2), [#allocation5], 4294967168 }
 0x206 PF: > { %s504_s16 = sand.u32 1, %s947_s18   ;;  %p1287_p3 = scmp.ge.s32.totalorder %s959_s21, 2 }
 0x207   : > { %s505_s1 = scalar_lea.sflag [#allocation13], %s504_s16 }
 0x208   : > { %p684_p6 = pnand %p1287_p3, %p1094_p12 }
 0x20a   : > { %p685_p8 = pneg %p684_p6 }
 0x20c   : > { %942 = dma.done.wait (%p685_p8), %s505_s1, 128  }
 0x20d   : > { %944 = vsyncadd (%p685_p8), %s505_s1, 4294967168  ;;  %s1288_s21 = sld [smem:[#allocation20_spill]]  ;;  %s1291_s18 = smov %s951_s19 }
 0x20e   : > { %s1289_s9 = sld [smem:[#allocation19_spill]] }
 0x20f   : > { %s1290_s20 = sld [smem:[#allocation21_spill]] }
 0x213   : > { %p24_p11 = scmp.ge.s32.totalorder %s1288_s21, 4  }
 0x214   : > { %s1292_s19 = smov %s1289_s9 }
 0x215   :  { %26 = sbr.rel (!%p24_p11) target bundleno = 12 (0xc), region = 127 }
 0x21a   :  { %511 = vsyncpa [#allocation4], 1 }
 0x21b   :  { %513 = vsyncpa [#allocation4 + $0x1], 1 }
 0x21c   :  { %514 = vsyncpa [#allocation7], 1 }
 0x21d   :  { %516 = vsyncpa [#allocation7 + $0x1], 1 }
 0x21e   :  { %517 = vsyncpa [#allocation10], 1 }
 0x21f   :  { %519 = vsyncpa [#allocation10 + $0x1], 1 }
 0x220   :  { %520 = vsyncpa [#allocation5], 1 }
 0x221   :  { %522 = vsyncpa [#allocation5 + $0x1], 1 }
 0x222   :  { %523 = vsyncpa [#allocation13], 1 }
 0x223   :  { %525 = vsyncpa [#allocation13 + $0x1], 1 }

</bundles_post_ra>
